<compile_context>
chip_gen: v5e
topology: v5e:2x2
jax: 0.10.0
libtpu: 0.0.40
codegen_flags: <defaults>
</compile_context>

<pallas_src>
import functools

import jax
import jax.numpy as jnp
from jax.experimental import pallas as pl
from jax.experimental.pallas import tpu as pltpu

F_IN = 4
F_OUT = 1
LANES = 128


def _rho_kernel(w_ref, b_ref, x_ref, o_ref):
    # w_ref: SMEM [F_IN] f32   (weight scalars)
    # b_ref: SMEM [F_OUT] f32  (bias scalar)
    # x_ref: VMEM [F_IN, block_rows, 128] f32  (batch folded lane-dense)
    # o_ref: VMEM [block_rows, 128] f32
    y = b_ref[0] + w_ref[0] * x_ref[0]
    for f in range(1, F_IN):            # static unroll: 3 more VPU FMAs per vreg
        y = y + w_ref[f] * x_ref[f]
    o_ref[...] = y.astype(o_ref.dtype)


@functools.partial(jax.jit, static_argnames=("max_block_rows",))
def rho_forward(x, weight, bias, *, max_block_rows=512):
    """x: [B, 4] f32, weight: [1, 4] f32, bias: [1] f32 -> [B, 1] f32."""
    B, f_in = x.shape
    assert f_in == F_IN
    assert weight.shape == (F_OUT, F_IN) and bias.shape == (F_OUT,)
    assert max_block_rows % 8 == 0

    # ---- lane-dense folding of the batch: B -> (rows, 128 lanes) ----------
    rows = pl.cdiv(B, LANES)
    if rows <= max_block_rows:
        block_rows = rows                # single grid step; block == full dims
        rows_pad = rows
    else:
        block_rows = max_block_rows      # multiple of 8 -> dense (8,128) tiles
        rows_pad = pl.cdiv(rows, block_rows) * block_rows
    b_pad = rows_pad * LANES

    x_pad = jnp.pad(x, ((0, b_pad - B), (0, 0)))            # [B_pad, 4]
    xt = x_pad.T.reshape(F_IN, rows_pad, LANES)              # [4, rows_pad, 128]

    w_flat = weight.reshape(F_IN).astype(jnp.float32)        # -> SMEM scalars
    b_flat = bias.reshape(F_OUT).astype(jnp.float32)         # -> SMEM scalar

    grid = (rows_pad // block_rows,)

    out = pl.pallas_call(
        _rho_kernel,
        out_shape=jax.ShapeDtypeStruct((rows_pad, LANES), x.dtype),
        grid_spec=pltpu.PrefetchScalarGridSpec(
            num_scalar_prefetch=0,
            grid=grid,
            in_specs=[
                pl.BlockSpec(memory_space=pltpu.MemorySpace.SMEM),   # weight [4]
                pl.BlockSpec(memory_space=pltpu.MemorySpace.SMEM),   # bias   [1]
                pl.BlockSpec((F_IN, block_rows, LANES), lambda i: (0, i, 0)),
            ],
            out_specs=pl.BlockSpec((block_rows, LANES), lambda i: (i, 0)),
        ),
        compiler_params=pltpu.CompilerParams(
            dimension_semantics=("parallel",),   # data-parallel batch tiles (v7x megacore)
        ),
        cost_estimate=pl.CostEstimate(
            flops=2 * F_IN * b_pad,
            transcendentals=0,
            bytes_accessed=(F_IN + F_OUT) * b_pad * 4 + (F_IN + F_OUT) * 4,
        ),
    )(w_flat, b_flat, xt)

    # Undo the lane-dense folding and drop the padded rows: (rows_pad,128) -> [B, 1].
    return out.reshape(b_pad)[:B].reshape(B, F_OUT)


if __name__ == "__main__":
    key = jax.random.PRNGKey(0)
    kx1, kx2, kw, kb = jax.random.split(key, 4)

    # Deterministic parameters mimicking PyTorch Linear default init:
    # U(-1/sqrt(fan_in), 1/sqrt(fan_in)).
    bound = 1.0 / jnp.sqrt(jnp.float32(F_IN))
    weight = jax.random.uniform(kw, (F_OUT, F_IN), jnp.float32, -bound, bound)
    bias = jax.random.uniform(kb, (F_OUT,), jnp.float32, -bound, bound)

    # Case 1: tiny batch (typical rho-head input), single grid step.
    B1 = 8
    x1 = jax.random.normal(kx1, (B1, F_IN), dtype=jnp.float32)
    y1 = rho_forward(x1, weight, bias)
    jax.block_until_ready(y1)
    ref1 = x1 @ weight.T + bias
    assert y1.shape == (B1, F_OUT)
    assert jnp.allclose(y1, ref1, atol=1e-5, rtol=1e-5)

    # Case 2: larger, non-multiple-of-128 batch with a small block to exercise the
    # tiled "parallel" grid and the pad/slice guard path.
    B2 = 2000
    x2 = jax.random.normal(kx2, (B2, F_IN), dtype=jnp.float32)
    y2 = rho_forward(x2, weight, bias, max_block_rows=8)
    jax.block_until_ready(y2)
    ref2 = x2 @ weight.T + bias
    assert y2.shape == (B2, F_OUT)
    assert jnp.allclose(y2, ref2, atol=1e-5, rtol=1e-5)

    print("KERNEL_OK")
</pallas_src>

<mosaic_0001>
module attributes {stable_mosaic.version = 11 : i64} {
  func.func @_rho_kernel(%arg0: i32, %arg1: memref<4xf32, #tpu.memory_space<smem>>, %arg2: memref<1xf32, #tpu.memory_space<smem>>, %arg3: memref<4x1x128xf32, #tpu.memory_space<vmem>>, %arg4: memref<1x128xf32, #tpu.memory_space<vmem>>) attributes {dimension_semantics = [#tpu.dimension_semantics<parallel>], iteration_bounds = array<i64: 1>, scalar_prefetch = 0 : i64, scratch_operands = 0 : i64, tpu.core_type = #tpu.core_type<tc>, window_params = [{transform_indices = @transform_0, window_bounds = array<i64: 4>}, {transform_indices = @transform_1, window_bounds = array<i64: 1>}, {transform_indices = @transform_2, window_bounds = array<i64: 4, 1, 128>}, {transform_indices = @transform_3, window_bounds = array<i64: 1, 128>}]} {
    %c0 = arith.constant 0 : index
    %0 = memref.load %arg2[%c0] : memref<1xf32, #tpu.memory_space<smem>>
    %c0_0 = arith.constant 0 : index
    %1 = memref.load %arg1[%c0_0] : memref<4xf32, #tpu.memory_space<smem>>
    %c0_1 = arith.constant 0 : index
    %c0_2 = arith.constant 0 : index
    %c0_3 = arith.constant 0 : index
    %2 = vector.load %arg3[%c0_1, %c0_2, %c0_3] : memref<4x1x128xf32, #tpu.memory_space<vmem>>, vector<1x1x128xf32>
    %3 = vector.shape_cast %2 : vector<1x1x128xf32> to vector<1x128xf32>
    %4 = vector.broadcast %1 : f32 to vector<1x128xf32>
    %5 = arith.mulf %4, %3 : vector<1x128xf32>
    %6 = vector.broadcast %0 : f32 to vector<1x128xf32>
    %7 = arith.addf %6, %5 : vector<1x128xf32>
    %c1 = arith.constant 1 : index
    %8 = memref.load %arg1[%c1] : memref<4xf32, #tpu.memory_space<smem>>
    %c1_4 = arith.constant 1 : index
    %c0_5 = arith.constant 0 : index
    %c0_6 = arith.constant 0 : index
    %9 = vector.load %arg3[%c1_4, %c0_5, %c0_6] : memref<4x1x128xf32, #tpu.memory_space<vmem>>, vector<1x1x128xf32>
    %10 = vector.shape_cast %9 : vector<1x1x128xf32> to vector<1x128xf32>
    %11 = vector.broadcast %8 : f32 to vector<1x128xf32>
    %12 = arith.mulf %11, %10 : vector<1x128xf32>
    %13 = arith.addf %7, %12 : vector<1x128xf32>
    %c2 = arith.constant 2 : index
    %14 = memref.load %arg1[%c2] : memref<4xf32, #tpu.memory_space<smem>>
    %c2_7 = arith.constant 2 : index
    %c0_8 = arith.constant 0 : index
    %c0_9 = arith.constant 0 : index
    %15 = vector.load %arg3[%c2_7, %c0_8, %c0_9] : memref<4x1x128xf32, #tpu.memory_space<vmem>>, vector<1x1x128xf32>
    %16 = vector.shape_cast %15 : vector<1x1x128xf32> to vector<1x128xf32>
    %17 = vector.broadcast %14 : f32 to vector<1x128xf32>
    %18 = arith.mulf %17, %16 : vector<1x128xf32>
    %19 = arith.addf %13, %18 : vector<1x128xf32>
    %c3 = arith.constant 3 : index
    %20 = memref.load %arg1[%c3] : memref<4xf32, #tpu.memory_space<smem>>
    %c3_10 = arith.constant 3 : index
    %c0_11 = arith.constant 0 : index
    %c0_12 = arith.constant 0 : index
    %21 = vector.load %arg3[%c3_10, %c0_11, %c0_12] : memref<4x1x128xf32, #tpu.memory_space<vmem>>, vector<1x1x128xf32>
    %22 = vector.shape_cast %21 : vector<1x1x128xf32> to vector<1x128xf32>
    %23 = vector.broadcast %20 : f32 to vector<1x128xf32>
    %24 = arith.mulf %23, %22 : vector<1x128xf32>
    %25 = arith.addf %19, %24 : vector<1x128xf32>
    %c0_13 = arith.constant 0 : index
    %c0_14 = arith.constant 0 : index
    %26 = vector.load %arg4[%c0_13, %c0_14] : memref<1x128xf32, #tpu.memory_space<vmem>>, vector<1x128xf32>
    tpu.vector_store %arg4[%c0_13, %c0_14], %25 {strides = array<i32>} : memref<1x128xf32, #tpu.memory_space<vmem>>, vector<1x128xf32>,
    return
  }
  func.func @transform_0(%arg0: i32) -> i32 {
    %c0_i32 = arith.constant 0 : i32
    %c0_i32_0 = arith.constant 0 : i32
    return %c0_i32 : i32
  }
  func.func @transform_1(%arg0: i32) -> i32 {
    %c0_i32 = arith.constant 0 : i32
    %c0_i32_0 = arith.constant 0 : i32
    return %c0_i32 : i32
  }
  func.func @transform_2(%arg0: i32) -> (i32, i32, i32) {
    %c0_i32 = arith.constant 0 : i32
    %c0_i32_0 = arith.constant 0 : i32
    %c0_i32_1 = arith.constant 0 : i32
    return %c0_i32, %arg0, %c0_i32_0 : i32, i32, i32
  }
  func.func @transform_3(%arg0: i32) -> (i32, i32) {
    %c0_i32 = arith.constant 0 : i32
    %c0_i32_0 = arith.constant 0 : i32
    return %arg0, %c0_i32 : i32, i32
  }
}

</mosaic_0001>

<bundles_post_ra>
// kernel: rho_forward.1
= control target key start
LH: loop header
LB: loop body
LE: loop exit
PB: predicated region body
PF: predicated region fallthrough
CT: control target
= control target key end

     0   :  { %9 = vsyncpa [#allocation4], 0  ;;  %s80_s15 = smov [#allocation3]   ;;  %s122_s0 = inlined_call_operand.vmem [shape: f32[4], index: 0, kind: input, shape index: {}]   ;;  %s123_s1 = inlined_call_operand.<no memory space> [shape: f32[1], index: 1, kind: input, shape index: {}]   ;;  %s124_s2 = inlined_call_operand.vmem [shape: f32[4,1,128], index: 2, kind: input, shape index: {}]   ;;  %s125_s3 = inlined_call_operand.vmem [shape: f32[1,128], index: 3, kind: output, shape index: {}]  }
   0x1   :  { %s15_s14 = sshll.u32 %s122_s0, 4  ;;  %s16_s14 = int_to_ptr.vmem [resolvable:$true] %s15_s14 }
   0x2   :  { %18 = dma.vmem_to_smem %s16_s14, 16, %s80_s15, [#allocation4]  }
   0x3   :  { %78 = dma.done.wait [#allocation4], 16  }
   0x4   :  { %79 = vsyncadd [#allocation4], 4294967280 }
   0x5   :  { %27 = sfence }
   0x6   :  { %s29_s16 = sld [smem:[#allocation3]]  ;;  %v30_v0 = vld [vmem:[%s124_s2] sm:$0x1]  ;;  %v60_v1 = vld [vmem:[%s124_s2 + $0x1] sm:$0x1]  ;;  %v33_v3 = vstv %s123_s1 }
   0x7   :  { %s59_s17 = sld [smem:[#allocation3 + $0x1]]  ;;  %v62_v4 = vld [vmem:[%s124_s2 + $0x2] sm:$0x1]  ;;  %v64_v9 = vld [vmem:[%s124_s2 + $0x3] sm:$0x1] }
   0x8   :  { %s61_s18 = sld [smem:[#allocation3 + $0x2]] }
   0x9   :  { %s63_s19 = sld [smem:[#allocation3 + $0x3]] }
   0xc   :  { %v31_v2 = vstv %s29_s16 }
   0xd   :  { %v32_v5 = vmul.f32 %v31_v2, %v30_v0  ;;  %v38_v6 = vstv %s59_s17 }
   0xe   :  { %v39_v7 = vmul.f32 %v60_v1, %v38_v6  ;;  %v44_v8 = vstv %s61_s18 }
   0xf   :  { %v34_v10 = vadd.f32 %v33_v3, %v32_v5  ;;  %v45_v11 = vmul.f32 %v62_v4, %v44_v8  ;;  %v50_v12 = vstv %s63_s19 }
  0x10   :  { %v51_v14 = vmul.f32 %v64_v9, %v50_v12 }
  0x11   :  { %v40_v13 = vadd.f32 %v39_v7, %v34_v10 }
  0x13   :  { %v46_v15 = vadd.f32 %v45_v11, %v40_v13 }
  0x15   :  { %v52_v16 = vadd.f32 %v51_v14, %v46_v15 }
  0x17   :  { %53 = vst [vmem:[%s125_s3] sm:$0x1] %v52_v16 }
  0x18   :  { %58 = vsyncpa [#allocation4], 1 }

</bundles_post_ra>
